<compile_context>
chip_gen: v5e
topology: v5e:2x2
jax: 0.10.0
libtpu: 0.0.40
codegen_flags: <defaults>
</compile_context>

<pallas_src>
import jax
import jax.numpy as jnp
from jax import lax
from jax.experimental import pallas as pl
from jax.experimental.pallas import tpu as pltpu


def cell_embedding_kernel(x_ref, w1_ref, b1_ref, w2_ref, b2_ref, o_ref):
    # fc1: (tile, in) . (hidden, in) contracting the in dims -> (tile, hidden).
    h = lax.dot_general(
        x_ref[...], w1_ref[...],
        dimension_numbers=(((1,), (1,)), ((), ())),
        preferred_element_type=jnp.float32,
    )
    h = h + b1_ref[...]                      # (1, hidden) broadcasts over sublanes
    # ELU (alpha = 1).  The clamp keeps the unselected branch finite for large
    # positive h (and for garbage rows in the ragged edge block).  exp() runs
    # on the EUP (slack here); exp(h) - 1 is within ~1 f32 ulp of expm1(h) at
    # these tolerances and exp is guaranteed to lower on every TPU generation.
    h = jnp.where(h > 0, h, jnp.exp(jnp.minimum(h, 0.0)) - 1.0)
    # fc2: (tile, hidden) . (out, hidden) contracting the hidden dims -> (tile, out).
    y = lax.dot_general(
        h.astype(w2_ref.dtype), w2_ref[...],
        dimension_numbers=(((1,), (1,)), ((), ())),
        preferred_element_type=jnp.float32,
    )
    o_ref[...] = (y + b2_ref[...]).astype(o_ref.dtype)


def _round_up(n, m):
    return ((n + m - 1) // m) * m


def _choose_tile(B, batch_tile):
    # Tiny batches: one full-extent block.  Block dims equal to the array dims
    # are always legal (no (8,128) divisibility requirement, no padding).
    if B <= 256:
        return B
    batch_tile = max(128, (batch_tile // 128) * 128)
    # Aim for an even number of grid steps (>=2) so v7x's two TensorCores get
    # an even split of the "parallel" batch axis; keep tiles multiples of 128
    # (sublane-aligned, lane-dense DMAs).
    steps = max(2, pl.cdiv(B, batch_tile))
    if steps % 2:
        steps += 1
    return min(batch_tile, _round_up(pl.cdiv(B, steps), 128))


def cell_embedding(x, w1, b1, w2, b2, *, batch_tile=8192):
    """fc2(elu(fc1(x))) with PyTorch-layout weights.

    x : (B, in_dim)
    w1: (hidden_dim, in_dim),  b1: (hidden_dim,)
    w2: (out_dim, hidden_dim), b2: (out_dim,)
    returns (B, out_dim)
    """
    B, in_dim = x.shape
    hidden_dim = w1.shape[0]
    out_dim = w2.shape[0]

    tile = _choose_tile(B, batch_tile)
    grid = (pl.cdiv(B, tile),)

    b1r = b1.reshape(1, hidden_dim)          # row biases broadcast over sublanes
    b2r = b2.reshape(1, out_dim)

    x_bytes = jnp.dtype(x.dtype).itemsize
    w_bytes = jnp.dtype(w1.dtype).itemsize
    cost = pl.CostEstimate(
        flops=2 * B * (in_dim * hidden_dim + hidden_dim * out_dim),
        transcendentals=B * hidden_dim,
        bytes_accessed=B * (in_dim + out_dim) * x_bytes
        + (w1.size + w2.size + b1.size + b2.size) * w_bytes,
    )

    out = pl.pallas_call(
        cell_embedding_kernel,
        out_shape=jax.ShapeDtypeStruct((B, out_dim), x.dtype),
        grid_spec=pltpu.PrefetchScalarGridSpec(
            num_scalar_prefetch=0,
            grid=grid,
            in_specs=[
                pl.BlockSpec((tile, in_dim), lambda i: (i, 0)),          # x tile
                pl.BlockSpec((hidden_dim, in_dim), lambda i: (0, 0)),    # W1 (resident)
                pl.BlockSpec((1, hidden_dim), lambda i: (0, 0)),         # b1
                pl.BlockSpec((out_dim, hidden_dim), lambda i: (0, 0)),   # W2 (resident)
                pl.BlockSpec((1, out_dim), lambda i: (0, 0)),            # b2
            ],
            out_specs=pl.BlockSpec((tile, out_dim), lambda i: (i, 0)),   # y tile
        ),
        compiler_params=pltpu.CompilerParams(
            dimension_semantics=("parallel",)),
        cost_estimate=cost,
    )(x, w1, b1r, w2, b2r)

    return out


def init_linear_params(key, in_features, out_features):
    # Deterministic init mimicking nn.Linear's uniform(-1/sqrt(in), 1/sqrt(in)),
    # stored in PyTorch layout: weight (out, in), bias (out,).
    kw, kb = jax.random.split(key)
    bound = 1.0 / jnp.sqrt(jnp.float32(in_features))
    w = jax.random.uniform(kw, (out_features, in_features), jnp.float32,
                           minval=-bound, maxval=bound)
    b = jax.random.uniform(kb, (out_features,), jnp.float32,
                           minval=-bound, maxval=bound)
    return w, b


if __name__ == "__main__":
    key = jax.random.PRNGKey(0)
    k_x1, k_x2, k_fc1, k_fc2 = jax.random.split(key, 4)

    in_dim, hidden_dim, out_dim = 32, 64, 16
    w1, b1 = init_linear_params(k_fc1, in_dim, hidden_dim)
    w2, b2 = init_linear_params(k_fc2, hidden_dim, out_dim)

    def reference(x):
        # Pure-JAX reference matching the PyTorch module.
        return jax.nn.elu(x @ w1.T + b1) @ w2.T + b2

    # Small batch: single full-extent block, one grid step.
    x_small = jax.random.normal(k_x1, (16, in_dim), jnp.float32)
    out_small = jax.block_until_ready(cell_embedding(x_small, w1, b1, w2, b2))
    assert out_small.shape == (16, out_dim)
    assert jnp.allclose(out_small, reference(x_small), atol=1e-5, rtol=1e-5)

    # Larger, non-multiple batch: exercises the 2-step "parallel" grid
    # (v7x dual TC) and the ragged last block (masked edge writes, no padding).
    x_big = jax.random.normal(k_x2, (300, in_dim), jnp.float32)
    out_big = jax.block_until_ready(cell_embedding(x_big, w1, b1, w2, b2))
    assert out_big.shape == (300, out_dim)
    assert jnp.allclose(out_big, reference(x_big), atol=1e-5, rtol=1e-5)

    print("KERNEL_OK")
</pallas_src>

<mosaic_0001>
module attributes {stable_mosaic.version = 11 : i64} {
  func.func @cell_embedding_kernel(%arg0: i32, %arg1: memref<16x32xf32, #tpu.memory_space<vmem>>, %arg2: memref<64x32xf32, #tpu.memory_space<vmem>>, %arg3: memref<1x64xf32, #tpu.memory_space<vmem>>, %arg4: memref<16x64xf32, #tpu.memory_space<vmem>>, %arg5: memref<1x16xf32, #tpu.memory_space<vmem>>, %arg6: memref<16x16xf32, #tpu.memory_space<vmem>>) attributes {dimension_semantics = [#tpu.dimension_semantics<parallel>], iteration_bounds = array<i64: 1>, scalar_prefetch = 0 : i64, scratch_operands = 0 : i64, tpu.core_type = #tpu.core_type<tc>, window_params = [{transform_indices = @transform_0, window_bounds = array<i64: 16, 32>}, {pipeline_mode = #tpu.pipeline_mode<synchronous>, transform_indices = @transform_1, window_bounds = array<i64: 64, 32>}, {pipeline_mode = #tpu.pipeline_mode<synchronous>, transform_indices = @transform_2, window_bounds = array<i64: 1, 64>}, {pipeline_mode = #tpu.pipeline_mode<synchronous>, transform_indices = @transform_3, window_bounds = array<i64: 16, 64>}, {pipeline_mode = #tpu.pipeline_mode<synchronous>, transform_indices = @transform_4, window_bounds = array<i64: 1, 16>}, {transform_indices = @transform_5, window_bounds = array<i64: 16, 16>}]} {
    %c0 = arith.constant 0 : index
    %c0_0 = arith.constant 0 : index
    %0 = vector.load %arg1[%c0, %c0_0] : memref<16x32xf32, #tpu.memory_space<vmem>>, vector<16x32xf32>
    %c0_1 = arith.constant 0 : index
    %c0_2 = arith.constant 0 : index
    %1 = vector.load %arg2[%c0_1, %c0_2] : memref<64x32xf32, #tpu.memory_space<vmem>>, vector<64x32xf32>
    %cst = arith.constant dense<0.000000e+00> : vector<16x64xf32>
    %2 = tpu.matmul %0, %1, %cst {dimension_numbers = #tpu.dot_dimension_numbers<[1], [1], [0], [0], [0, 0, 1, 0], [], []>} : vector<16x32xf32>, vector<64x32xf32>, vector<16x64xf32> -> vector<16x64xf32>
    %c0_3 = arith.constant 0 : index
    %c0_4 = arith.constant 0 : index
    %3 = vector.load %arg3[%c0_3, %c0_4] : memref<1x64xf32, #tpu.memory_space<vmem>>, vector<1x64xf32>
    %4 = vector.broadcast %3 : vector<1x64xf32> to vector<16x64xf32>
    %5 = arith.addf %2, %4 : vector<16x64xf32>
    %cst_5 = arith.constant 0.000000e+00 : f32
    %6 = vector.broadcast %cst_5 : f32 to vector<16x64xf32>
    %7 = arith.cmpf ogt, %5, %6 : vector<16x64xf32>
    %cst_6 = arith.constant 0.000000e+00 : f32
    %8 = vector.broadcast %cst_6 : f32 to vector<16x64xf32>
    %9 = arith.minimumf %5, %8 : vector<16x64xf32>
    %10 = math.exp %9 : vector<16x64xf32>
    %cst_7 = arith.constant 1.000000e+00 : f32
    %11 = vector.broadcast %cst_7 : f32 to vector<16x64xf32>
    %12 = arith.subf %10, %11 : vector<16x64xf32>
    %13 = arith.select %7, %5, %12 : vector<16x64xi1>, vector<16x64xf32>
    %c0_8 = arith.constant 0 : index
    %c0_9 = arith.constant 0 : index
    %14 = vector.load %arg4[%c0_8, %c0_9] : memref<16x64xf32, #tpu.memory_space<vmem>>, vector<16x64xf32>
    %cst_10 = arith.constant dense<0.000000e+00> : vector<16x16xf32>
    %15 = tpu.matmul %13, %14, %cst_10 {dimension_numbers = #tpu.dot_dimension_numbers<[1], [1], [0], [0], [0, 0, 1, 0], [], []>} : vector<16x64xf32>, vector<16x64xf32>, vector<16x16xf32> -> vector<16x16xf32>
    %c0_11 = arith.constant 0 : index
    %c0_12 = arith.constant 0 : index
    %16 = vector.load %arg5[%c0_11, %c0_12] : memref<1x16xf32, #tpu.memory_space<vmem>>, vector<1x16xf32>
    %17 = vector.broadcast %16 : vector<1x16xf32> to vector<16x16xf32>
    %18 = arith.addf %15, %17 : vector<16x16xf32>
    %c0_13 = arith.constant 0 : index
    %c0_14 = arith.constant 0 : index
    %19 = vector.load %arg6[%c0_13, %c0_14] : memref<16x16xf32, #tpu.memory_space<vmem>>, vector<16x16xf32>
    tpu.vector_store %arg6[%c0_13, %c0_14], %18 {strides = array<i32>} : memref<16x16xf32, #tpu.memory_space<vmem>>, vector<16x16xf32>,
    return
  }
  func.func @transform_0(%arg0: i32) -> (i32, i32) {
    %c0_i32 = arith.constant 0 : i32
    %c0_i32_0 = arith.constant 0 : i32
    return %arg0, %c0_i32 : i32, i32
  }
  func.func @transform_1(%arg0: i32) -> (i32, i32) {
    %c0_i32 = arith.constant 0 : i32
    %c0_i32_0 = arith.constant 0 : i32
    %c0_i32_1 = arith.constant 0 : i32
    return %c0_i32, %c0_i32_0 : i32, i32
  }
  func.func @transform_2(%arg0: i32) -> (i32, i32) {
    %c0_i32 = arith.constant 0 : i32
    %c0_i32_0 = arith.constant 0 : i32
    %c0_i32_1 = arith.constant 0 : i32
    return %c0_i32, %c0_i32_0 : i32, i32
  }
  func.func @transform_3(%arg0: i32) -> (i32, i32) {
    %c0_i32 = arith.constant 0 : i32
    %c0_i32_0 = arith.constant 0 : i32
    %c0_i32_1 = arith.constant 0 : i32
    return %c0_i32, %c0_i32_0 : i32, i32
  }
  func.func @transform_4(%arg0: i32) -> (i32, i32) {
    %c0_i32 = arith.constant 0 : i32
    %c0_i32_0 = arith.constant 0 : i32
    %c0_i32_1 = arith.constant 0 : i32
    return %c0_i32, %c0_i32_0 : i32, i32
  }
  func.func @transform_5(%arg0: i32) -> (i32, i32) {
    %c0_i32 = arith.constant 0 : i32
    %c0_i32_0 = arith.constant 0 : i32
    return %arg0, %c0_i32 : i32, i32
  }
}

</mosaic_0001>

<bundles_post_ra>
// kernel: tpu_custom_call.1
= control target key start
LH: loop header
LB: loop body
LE: loop exit
PB: predicated region body
PF: predicated region fallthrough
CT: control target
= control target key end

     0   :  { %vm35_vm0 = vcmask 261120   ;;  %s323_s0 = inlined_call_operand.vmem [shape: f32[16,32], index: 0, kind: input, shape index: {}]   ;;  %s324_s1 = inlined_call_operand.vmem [shape: f32[64,32], index: 1, kind: input, shape index: {}]   ;;  %s325_s2 = inlined_call_operand.vmem [shape: f32[1,64], index: 2, kind: input, shape index: {}]   ;;  %s326_s3 = inlined_call_operand.vmem [shape: f32[16,64], index: 3, kind: input, shape index: {}]   ;;  %s327_s4 = inlined_call_operand.vmem [shape: f32[1,16], index: 4, kind: input, shape index: {}]   ;;  %s328_s5 = inlined_call_operand.hbm [shape: f32[16,16], index: 5, kind: output, shape index: {}]  }
   0x1   :  { %v30_v0 = vld [vmem:[%s324_s1 + $0x38] sm:$0xff]  ;;  %v29_v1 = vld [vmem:[%s324_s1 + $0x30] sm:$0xff] }
   0x2   :  { %164 = vmatpush.xpose.msk.msra.mxu0 %vm35_vm0, %v30_v0  ;;  %180 = vmatpush.xpose.msk.msra.mxu2 %vm35_vm0, %v30_v0 }
   0x3   :  { %10 = vsyncpa [#allocation3], 0  ;;  %v28_v2 = vld [vmem:[%s324_s1 + $0x28] sm:$0xff]  ;;  %v27_v3 = vld [vmem:[%s324_s1 + $0x20] sm:$0xff]  ;;  %vm107_vm1 = vcmask 523264   ;;  %vm143_vm4 = vcmask 130048  }
   0x4   :  { %v26_v4 = vld [vmem:[%s324_s1 + $0x18] sm:$0xff]  ;;  %v25_v5 = vld [vmem:[%s324_s1 + $0x10] sm:$0xff]  ;;  %v24_v6 = vld [vmem:[%s324_s1 + $0x8] sm:$0xff]  ;;  %s152_s21 = sshll.u32 %s328_s5, 4  ;;  %s224_s22 = smov 128   ;;  %s153_s21 = int_to_ptr.hbm [resolvable:$true] %s152_s21 }
   0x5   :  { %v23_v7 = vld [vmem:[%s324_s1] sm:$0xff]  ;;  %v22_v9 = vld [vmem:[%s323_s0 + $0x8] sm:$0xff]  ;;  %s225_s23 = smov 8  }
   0x6   :  { %165 = vmatpush.xpose.msk.msra.mxu0 %vm35_vm0, %v29_v1  ;;  %181 = vmatpush.xpose.msk.msra.mxu2 %vm35_vm0, %v29_v1  ;;  %v21_v8 = vld [vmem:[%s323_s0] sm:$0xff]  ;;  %v102_v10 = vld [vmem:[%s326_s3 + $0x8] sm:$0xff] }
   0x7   :  { %176 = vmatpush.xpose.msk.msra.mxu1 %vm107_vm1, %v102_v10  ;;  %v101_v11 = vld [vmem:[%s326_s3] sm:$0xff]  ;;  %s223_s3 = smov [#allocation2]  }
   0x8   :  { %v191_v12 = vld [vmem:[%s325_s2] ss:$0 sm:$0xff]  ;;  %s150_s18 = sshll.u32 %s223_s3, 4  ;;  %s151_s18 = int_to_ptr.vmem [resolvable:$true] %s150_s18 }
   0x9   :  { %v192_v27 = vld [vmem:[%s327_s4] ss:$0 sm:$0xff] }
   0xa   :  { %166 = vmatpush.xpose.msk.msra.mxu0 %vm35_vm0, %v28_v2  ;;  %182 = vmatpush.xpose.msk.msra.mxu2 %vm35_vm0, %v28_v2 }
   0xb   :  { %177 = vmatpush.xpose.msk.msra.mxu1 %vm107_vm1, %v101_v11 }
   0xe   :  { %167 = vmatpush.xpose.msk.msra.mxu0 %vm35_vm0, %v27_v3  ;;  %183 = vmatpush.xpose.msk.msra.mxu2 %vm35_vm0, %v27_v3 }
  0x12   :  { %168 = vmatpush.xpose.msk.msra.mxu0 %vm35_vm0, %v26_v4  ;;  %184 = vmatpush.xpose.msk.msra.mxu2 %vm35_vm0, %v26_v4 }
  0x16   :  { %169 = vmatpush.xpose.msk.msra.mxu0 %vm35_vm0, %v25_v5  ;;  %185 = vmatpush.xpose.msk.msra.mxu2 %vm35_vm0, %v25_v5 }
  0x1a   :  { %170 = vmatpush.xpose.msk.msra.mxu0 %vm35_vm0, %v24_v6  ;;  %186 = vmatpush.xpose.msk.msra.mxu2 %vm35_vm0, %v24_v6 }
  0x1e   :  { %171 = vmatpush.xpose.msk.msra.mxu0 %vm35_vm0, %v23_v7  ;;  %187 = vmatpush.xpose.msk.msra.mxu2 %vm35_vm0, %v23_v7 }
  0x21   :  { %172 = vmatmul.msk.f32.vlgmr.msra.gmra.mxu0 %vm35_vm0, %v21_v8  ;;  %173 = vmatmul.msk.f32.vlgmr.msra.gmra.mxu2 %vm35_vm0, %v22_v9 }
  0x9e   :  { %v83_v13 = vpop.f32.mrf.mxu0 }
  0x9f   :  { %v84_v14 = vadd.f32 %v191_v12, %v83_v13 }
  0xa1   :  { %v91_v15 = vmin.f32 %v84_v14, 0.0  ;;  %vm89_vm2 = vcmp.gt.f32.partialorder %v84_v14, 0.0 }
  0xa3   :  { %v93_v16 = vmul.f32 1.442695, %v91_v15 }
  0xa4   :  { %v86_v17 = vpop.f32.mrf.mxu2 }
  0xa5   :  { %193 = vpow2.f32 %v93_v16  ;;  %v87_v18 = vadd.f32 %v191_v12, %v86_v17 }
  0xa7   :  { %v92_v19 = vmin.f32 %v87_v18, 0.0  ;;  %vm90_vm3 = vcmp.gt.f32.partialorder %v87_v18, 0.0 }
  0xa9   :  { %v95_v20 = vmul.f32 1.442695, %v92_v19 }
  0xab   :  { %v194_v21 = vpop.eup %193  ;;  %195 = vpow2.f32 %v95_v20 }
  0xac   :  { %v174_v22 = vadd.f32 -1.0, %v194_v21 }
  0xae   :  { %v99_v23 = vsel %vm89_vm2, %v84_v14, %v174_v22 }
  0xaf   :  { %178 = vmatmul.msk.f32.vlgmr.msra.gmra.mxu1 %vm107_vm1, %v99_v23 }
  0xb1   :  { %v196_v24 = vpop.eup %195 }
  0xb2   :  { %v175_v25 = vadd.f32 -1.0, %v196_v24 }
  0xb4   :  { %v100_v26 = vsel %vm90_vm3, %v87_v18, %v175_v25 }
  0xb7   :  { %179 = vmatmul.msk.f32.gmra.mxu1 %vm107_vm1, %v100_v26 }
 0x12c   :  { %v137_v28 = vpop.f32.mrf.mxu1 }
 0x12d   :  { %v138_v29 = vadd.f32 %v192_v27, %v137_v28 }
 0x12f   :  { %144 = vst.msk [vmem:[#allocation2] sm:$0xff] %vm143_vm4, %v138_v29 }
 0x134   :  { %v140_v30 = vpop.f32.mrf.mxu1 }
 0x135   :  { %v141_v31 = vadd.f32 %v192_v27, %v140_v30 }
 0x137   :  { %145 = vst.msk [vmem:[#allocation2 + $0x8] sm:$0xff] %vm143_vm4, %v141_v31 }
 0x138   :  { %158 = dma.vmem_to_hbm [thread:$0]  %s151_s18, 256, %s153_s21, [#allocation3], %s224_s22, %s224_s22, %s225_s23  }
 0x139   :  { %221 = dma.done.wait [#allocation3], 256  }
 0x13a   :  { %222 = vsyncadd [#allocation3], 4294967040 }
 0x13b   :  { %163 = vsyncpa [#allocation3], 1 }

</bundles_post_ra>
